<compile_context>
chip_gen: v5e
topology: v5e:2x2
jax: 0.10.0
libtpu: 0.0.40
codegen_flags: <defaults>
</compile_context>

<pallas_src>
import functools

import jax
import jax.numpy as jnp
import numpy as np
from jax.experimental import pallas as pl
from jax.experimental.pallas import tpu as pltpu


def _gru_gate_math(s, x, w_s_ref, w_x_ref, b_row, wm_s_ref):
    """One GRU-cell update. f32 elementwise math, f32 MXU accumulation."""
    H = s.shape[1]
    # input-side pre-activations for [reset | update | map] + fused bias row
    gx = jnp.dot(x, w_x_ref[...], preferred_element_type=jnp.float32) + b_row
    # state-side pre-activations for [reset | update]
    gs = jnp.dot(s, w_s_ref[...], preferred_element_type=jnp.float32)
    ru = jax.nn.sigmoid(gx[:, :2 * H] + gs)       # one EUP dispatch, 2H lanes
    r = ru[:, :H]                                 # reset gate
    u = ru[:, H:]                                 # update gate
    # candidate: tanh((r*s) @ W_map_state + x @ W_map_input + b_map)
    m = jnp.tanh(gx[:, 2 * H:]
                 + jnp.dot(r * s, wm_s_ref[...],
                           preferred_element_type=jnp.float32))
    return (1.0 - u) * s + u * m


# ----------------------------------------------------------------------------
# Single-step kernel (exactly the module's forward).
# ----------------------------------------------------------------------------
def _gru_cell_kernel(state_ref, x_ref, w_s_ref, w_x_ref, b_ref, wm_s_ref,
                     out_ref):
    new_s = _gru_gate_math(state_ref[...], x_ref[...], w_s_ref, w_x_ref,
                           b_ref[...], wm_s_ref)
    out_ref[...] = new_s.astype(out_ref.dtype)


@jax.jit
def unpacked_gru_step(state, _input, w_s, w_x, b, wm_s):
    """One UnpackedGru forward step.

    state : (B, H) f32
    _input: (B, I) f32
    w_s   : (H, 2H) f32  -- [W_reset_state | W_update_state]
    w_x   : (I, 3H) f32  -- [W_reset_in | W_update_in | W_map_in]
    b     : (1, 3H) f32  -- [b_reset | b_update | b_map]
    wm_s  : (H, H)  f32  -- state part of the map (candidate) weight
    """
    B, H = state.shape
    vmem = pl.BlockSpec(memory_space=pltpu.MemorySpace.VMEM)
    return pl.pallas_call(
        _gru_cell_kernel,
        out_shape=jax.ShapeDtypeStruct((B, H), state.dtype),
        in_specs=[vmem] * 6,
        out_specs=vmem,
    )(state, _input, w_s, w_x, b, wm_s)


# ----------------------------------------------------------------------------
# Sequence kernel: whole time loop inside one pallas_call.
# ----------------------------------------------------------------------------
def _gru_seq_kernel(x_ref, state0_ref, w_s_ref, w_x_ref, b_ref, wm_s_ref,
                    out_ref, state_sc):
    @pl.when(pl.program_id(0) == 0)
    def _():
        state_sc[...] = state0_ref[...].astype(jnp.float32)

    t_block = x_ref.shape[0]
    b_row = b_ref[...]          # hoisted: read fused bias row once per block

    states = []
    for lt in range(t_block):   # small static unrolled loop
        s = state_sc[...]
        new_s = _gru_gate_math(s, x_ref[lt], w_s_ref, w_x_ref, b_row, wm_s_ref)
        state_sc[...] = new_s
        states.append(new_s)

    # Lane-dense flush: one (B, t_block*H) >= 128-lane-wide store per grid step.
    out_ref[0, :, :] = jnp.concatenate(states, axis=-1).astype(out_ref.dtype)


@functools.partial(jax.jit, static_argnames=("t_block",))
def unpacked_gru_sequence(state0, xs, w_s, w_x, b, wm_s, *, t_block=4):
    """Apply the GRU cell over a (T, B, I) sequence in a single pallas_call.

    Returns all per-step states, shape (T, B, H)."""
    T, B, I = xs.shape
    H = state0.shape[1]
    assert T % t_block == 0, "T must be a multiple of t_block"
    n_blocks = T // t_block

    out = pl.pallas_call(
        _gru_seq_kernel,
        out_shape=jax.ShapeDtypeStruct((n_blocks, B, t_block * H),
                                       state0.dtype),
        grid_spec=pltpu.PrefetchScalarGridSpec(
            num_scalar_prefetch=0,
            grid=(n_blocks,),
            in_specs=[
                pl.BlockSpec((t_block, B, I), lambda tb: (tb, 0, 0)),  # xs
                pl.BlockSpec((B, H), lambda tb: (0, 0)),               # state0
                pl.BlockSpec((H, 2 * H), lambda tb: (0, 0)),           # w_s
                pl.BlockSpec((I, 3 * H), lambda tb: (0, 0)),           # w_x
                pl.BlockSpec((1, 3 * H), lambda tb: (0, 0)),           # b
                pl.BlockSpec((H, H), lambda tb: (0, 0)),               # wm_s
            ],
            out_specs=pl.BlockSpec((1, B, t_block * H),
                                   lambda tb: (tb, 0, 0)),
            scratch_shapes=[pltpu.VMEM((B, H), jnp.float32)],          # state
        ),
        compiler_params=pltpu.CompilerParams(
            dimension_semantics=("arbitrary",)),
    )(xs, state0, w_s, w_x, b, wm_s)

    # (n_blocks, B, t_block*H) -> (T, B, H)  (layout plumbing in XLA)
    out = out.reshape(n_blocks, B, t_block, H)
    out = out.transpose(0, 2, 1, 3).reshape(T, B, H)
    return out


# ----------------------------------------------------------------------------
# Parameter init / fusion (mimics nn.Linear(hidden+input -> hidden) x3).
# ----------------------------------------------------------------------------
def init_params(key, input_size, hidden_size):
    """PyTorch stores weight as (out=H, in=H+I) and computes x @ W.T + b with
    x = cat([state, input], dim=1).  We store the transpose (in, out): the
    first H rows act on the state, the last I rows act on the input."""
    fan_in = input_size + hidden_size
    bound = 1.0 / np.sqrt(fan_in)
    keys = jax.random.split(key, 6)

    def linear(kw, kb):
        w_t = jax.random.uniform(kw, (fan_in, hidden_size), jnp.float32,
                                 -bound, bound)          # (in, out)
        bias = jax.random.uniform(kb, (1, hidden_size), jnp.float32,
                                  -bound, bound)
        return w_t, bias

    wr, br = linear(keys[0], keys[1])
    wm, bm = linear(keys[2], keys[3])
    wu, bu = linear(keys[4], keys[5])
    return dict(wr=wr, br=br, wm=wm, bm=bm, wu=wu, bu=bu)


def fuse_params(params, hidden_size):
    """Split/fuse weights for the kernel:
       w_s  (H, 2H): [W_reset_state | W_update_state]       (applied to state)
       w_x  (I, 3H): [W_reset_in | W_update_in | W_map_in]  (applied to input)
       b    (1, 3H): [b_reset | b_update | b_map]
       wm_s (H, H) : state part of the map weight (applied to r*state)."""
    H = hidden_size
    w_s = jnp.concatenate([params["wr"][:H], params["wu"][:H]], axis=1)
    w_x = jnp.concatenate([params["wr"][H:], params["wu"][H:],
                           params["wm"][H:]], axis=1)
    b = jnp.concatenate([params["br"], params["bu"], params["bm"]], axis=1)
    wm_s = params["wm"][:H]
    return w_s, w_x, b, wm_s


# ----------------------------------------------------------------------------
# Pure-JAX references.
# ----------------------------------------------------------------------------
def unpacked_gru_reference(state, _input, params):
    cat_si = jnp.concatenate([state, _input], axis=1)
    r = jax.nn.sigmoid(cat_si @ params["wr"] + params["br"])
    reseted = r * state
    cat_rs = jnp.concatenate([reseted, _input], axis=1)
    m = jnp.tanh(cat_rs @ params["wm"] + params["bm"])
    u = jax.nn.sigmoid(cat_si @ params["wu"] + params["bu"])
    return (1.0 - u) * state + u * m


def unpacked_gru_sequence_reference(state0, xs, params):
    s = state0
    outs = []
    for t in range(xs.shape[0]):
        s = unpacked_gru_reference(s, xs[t], params)
        outs.append(s)
    return jnp.stack(outs, axis=0)


if __name__ == "__main__":
    batch, input_size, hidden_size = 8, 16, 32
    seq_len, t_block = 8, 4

    key = jax.random.PRNGKey(0)
    k_param, k_state, k_input, k_seq = jax.random.split(key, 4)

    params = init_params(k_param, input_size, hidden_size)
    w_s, w_x, b, wm_s = fuse_params(params, hidden_size)

    state = jax.random.normal(k_state, (batch, hidden_size), jnp.float32)
    _input = jax.random.normal(k_input, (batch, input_size), jnp.float32)
    xs = jax.random.normal(k_seq, (seq_len, batch, input_size), jnp.float32)

    # 1) Single step: exactly the module's forward.
    out = jax.block_until_ready(
        unpacked_gru_step(state, _input, w_s, w_x, b, wm_s))
    ref = jax.block_until_ready(unpacked_gru_reference(state, _input, params))
    np.testing.assert_allclose(np.asarray(out), np.asarray(ref),
                               rtol=1e-5, atol=1e-5)

    # 2) Whole sequence in ONE pallas_call (VMEM-resident weights, state
    #    carried in VMEM scratch, lane-dense per-block output flushes).
    seq_out = jax.block_until_ready(
        unpacked_gru_sequence(state, xs, w_s, w_x, b, wm_s, t_block=t_block))
    seq_ref = jax.block_until_ready(
        unpacked_gru_sequence_reference(state, xs, params))
    np.testing.assert_allclose(np.asarray(seq_out), np.asarray(seq_ref),
                               rtol=1e-4, atol=1e-4)

    print("KERNEL_OK")
</pallas_src>

<mosaic_0001>
module attributes {stable_mosaic.version = 11 : i64} {
  func.func @_gru_cell_kernel(%arg0: memref<8x32xf32, #tpu.memory_space<vmem>>, %arg1: memref<8x16xf32, #tpu.memory_space<vmem>>, %arg2: memref<32x64xf32, #tpu.memory_space<vmem>>, %arg3: memref<16x96xf32, #tpu.memory_space<vmem>>, %arg4: memref<1x96xf32, #tpu.memory_space<vmem>>, %arg5: memref<32x32xf32, #tpu.memory_space<vmem>>, %arg6: memref<8x32xf32, #tpu.memory_space<vmem>>) attributes {dimension_semantics = [], scalar_prefetch = 0 : i64, scratch_operands = 0 : i64, tpu.core_type = #tpu.core_type<tc>} {
    %c0 = arith.constant 0 : index
    %c0_0 = arith.constant 0 : index
    %0 = vector.load %arg0[%c0, %c0_0] : memref<8x32xf32, #tpu.memory_space<vmem>>, vector<8x32xf32>
    %c0_1 = arith.constant 0 : index
    %c0_2 = arith.constant 0 : index
    %1 = vector.load %arg1[%c0_1, %c0_2] : memref<8x16xf32, #tpu.memory_space<vmem>>, vector<8x16xf32>
    %c0_3 = arith.constant 0 : index
    %c0_4 = arith.constant 0 : index
    %2 = vector.load %arg4[%c0_3, %c0_4] : memref<1x96xf32, #tpu.memory_space<vmem>>, vector<1x96xf32>
    %c0_5 = arith.constant 0 : index
    %c0_6 = arith.constant 0 : index
    %3 = vector.load %arg3[%c0_5, %c0_6] : memref<16x96xf32, #tpu.memory_space<vmem>>, vector<16x96xf32>
    %cst = arith.constant dense<0.000000e+00> : vector<8x96xf32>
    %4 = tpu.matmul %1, %3, %cst {dimension_numbers = #tpu.dot_dimension_numbers<[1], [0], [0], [1], [0, 0, 1, 1], [], []>} : vector<8x16xf32>, vector<16x96xf32>, vector<8x96xf32> -> vector<8x96xf32>
    %5 = vector.broadcast %2 : vector<1x96xf32> to vector<8x96xf32>
    %6 = arith.addf %4, %5 : vector<8x96xf32>
    %c0_7 = arith.constant 0 : index
    %c0_8 = arith.constant 0 : index
    %7 = vector.load %arg2[%c0_7, %c0_8] : memref<32x64xf32, #tpu.memory_space<vmem>>, vector<32x64xf32>
    %cst_9 = arith.constant dense<0.000000e+00> : vector<8x64xf32>
    %8 = tpu.matmul %0, %7, %cst_9 {dimension_numbers = #tpu.dot_dimension_numbers<[1], [0], [0], [1], [0, 0, 1, 1], [], []>} : vector<8x32xf32>, vector<32x64xf32>, vector<8x64xf32> -> vector<8x64xf32>
    %9 = vector.extract_strided_slice %6 {offsets = [0, 0], sizes = [8, 64], strides = [1, 1]} : vector<8x96xf32> to vector<8x64xf32>
    %10 = arith.addf %9, %8 : vector<8x64xf32>
    %11 = arith.negf %10 : vector<8x64xf32>
    %12 = math.exp %11 : vector<8x64xf32>
    %cst_10 = arith.constant 1.000000e+00 : f32
    %13 = vector.broadcast %cst_10 : f32 to vector<8x64xf32>
    %14 = arith.addf %13, %12 : vector<8x64xf32>
    %15 = arith.divf %13, %14 : vector<8x64xf32>
    %16 = vector.extract_strided_slice %15 {offsets = [0, 0], sizes = [8, 32], strides = [1, 1]} : vector<8x64xf32> to vector<8x32xf32>
    %17 = vector.extract_strided_slice %15 {offsets = [0, 32], sizes = [8, 32], strides = [1, 1]} : vector<8x64xf32> to vector<8x32xf32>
    %18 = vector.extract_strided_slice %6 {offsets = [0, 64], sizes = [8, 32], strides = [1, 1]} : vector<8x96xf32> to vector<8x32xf32>
    %19 = arith.mulf %16, %0 : vector<8x32xf32>
    %c0_11 = arith.constant 0 : index
    %c0_12 = arith.constant 0 : index
    %20 = vector.load %arg5[%c0_11, %c0_12] : memref<32x32xf32, #tpu.memory_space<vmem>>, vector<32x32xf32>
    %cst_13 = arith.constant dense<0.000000e+00> : vector<8x32xf32>
    %21 = tpu.matmul %19, %20, %cst_13 {dimension_numbers = #tpu.dot_dimension_numbers<[1], [0], [0], [1], [0, 0, 1, 1], [], []>} : vector<8x32xf32>, vector<32x32xf32>, vector<8x32xf32> -> vector<8x32xf32>
    %22 = arith.addf %18, %21 : vector<8x32xf32>
    %23 = math.tanh %22 : vector<8x32xf32>
    %cst_14 = arith.constant 1.000000e+00 : f32
    %24 = vector.broadcast %cst_14 : f32 to vector<8x32xf32>
    %25 = arith.subf %24, %17 : vector<8x32xf32>
    %26 = arith.mulf %25, %0 : vector<8x32xf32>
    %27 = arith.mulf %17, %23 : vector<8x32xf32>
    %28 = arith.addf %26, %27 : vector<8x32xf32>
    %c0_15 = arith.constant 0 : index
    %c0_16 = arith.constant 0 : index
    %29 = vector.load %arg6[%c0_15, %c0_16] : memref<8x32xf32, #tpu.memory_space<vmem>>, vector<8x32xf32>
    tpu.vector_store %arg6[%c0_15, %c0_16], %28 {strides = array<i32>} : memref<8x32xf32, #tpu.memory_space<vmem>>, vector<8x32xf32>,
    return
  }
}

</mosaic_0001>

<bundles_post_ra>
// kernel: unpacked_gru_step.1
= control target key start
LH: loop header
LB: loop body
LE: loop exit
PB: predicated region body
PF: predicated region fallthrough
CT: control target
= control target key end

     0   :  { %11 = vsyncpa [#allocation3], 0  ;;  %s491_s0 = inlined_call_operand.hbm [shape: f32[8,32], index: 0, kind: input, shape index: {}]   ;;  %s492_s1 = inlined_call_operand.hbm [shape: f32[8,16], index: 1, kind: input, shape index: {}]   ;;  %s493_s2 = inlined_call_operand.hbm [shape: f32[32,64], index: 2, kind: input, shape index: {}]   ;;  %s494_s3 = inlined_call_operand.hbm [shape: f32[16,96], index: 3, kind: input, shape index: {}]   ;;  %s495_s4 = inlined_call_operand.vmem [shape: f32[1,96], index: 4, kind: input, shape index: {}]   ;;  %s496_s5 = inlined_call_operand.hbm [shape: f32[32,32], index: 5, kind: input, shape index: {}]   ;;  %s497_s6 = inlined_call_operand.hbm [shape: f32[8,32], index: 6, kind: output, shape index: {}]  }
   0x1   :  { %12 = vsyncpa [#allocation6], 0 }
   0x2   :  { %13 = vsyncpa [#allocation9], 0  ;;  %s31_s23 = sshll.u32 %s492_s1, 4  ;;  %s32_s23 = int_to_ptr.hbm [resolvable:$true] %s31_s23 }
   0x3   :  { %14 = vsyncpa [#allocation4], 0  ;;  %s421_s24 = smov [#allocation5]   ;;  %s54_s28 = sshll.u32 %s494_s3, 4  ;;  %s55_s28 = int_to_ptr.hbm [resolvable:$true] %s54_s28 }
   0x4   :  { %s33_s25 = sshll.u32 %s421_s24, 4  ;;  %s422_s29 = smov [#allocation8]   ;;  %s34_s25 = int_to_ptr.vmem [resolvable:$true] %s33_s25 }
   0x5   :  { %36 = dma.hbm_to_vmem [thread:$0]  %s32_s23, 128, %s34_s25, [#allocation6]  }
   0x6   :  { %s56_s30 = sshll.u32 %s422_s29, 4  ;;  %s20_s9 = sshll.u32 %s491_s0, 4  ;;  %s57_s30 = int_to_ptr.vmem [resolvable:$true] %s56_s30  ;;  %s21_s9 = int_to_ptr.hbm [resolvable:$true] %s20_s9 }
   0x7   :  { %s423_s1 = smov 128   ;;  %s424_s10 = smov 8  }
   0x8   :  { %62 = dma.hbm_to_vmem [thread:$0]  %s55_s28, 256, %s57_s30, [#allocation9], %s423_s1, %s423_s1, %s424_s10  }
   0x9   :  { %s41_s13 = sshll.u32 %s493_s2, 4  ;;  %s425_s14 = smov [#allocation2]   ;;  %s42_s13 = int_to_ptr.hbm [resolvable:$true] %s41_s13 }
   0xa   :  { %s22_s15 = sshll.u32 %s425_s14, 4  ;;  %s426_s3 = smov [#allocation7]   ;;  %s23_s15 = int_to_ptr.vmem [resolvable:$true] %s22_s15 }
   0xb   :  { %25 = dma.hbm_to_vmem [thread:$0]  %s21_s9, 128, %s23_s15, [#allocation3]  }
   0xc   :  { %s43_s16 = sshll.u32 %s426_s3, 4  ;;  %s69_s0 = sshll.u32 %s496_s5, 4  ;;  %s44_s16 = int_to_ptr.vmem [resolvable:$true] %s43_s16  ;;  %s70_s0 = int_to_ptr.hbm [resolvable:$true] %s69_s0 }
   0xd   :  { %49 = dma.hbm_to_vmem [thread:$0]  %s42_s13, 512, %s44_s16, [#allocation6], %s423_s1, %s423_s1, %s424_s10  }
   0xe   :  { %s427_s19 = smov [#allocation10]  }
   0xf   :  { %s71_s20 = sshll.u32 %s427_s19, 4  ;;  %s72_s20 = int_to_ptr.vmem [resolvable:$true] %s71_s20 }
  0x10   :  { %77 = dma.hbm_to_vmem [thread:$0]  %s70_s0, 512, %s72_s20, [#allocation9], %s423_s1, %s423_s1, %s424_s10  }
  0x11   :  { %413 = dma.done.wait [#allocation3], 128  }
  0x12   :  { %414 = vsyncadd [#allocation3], 4294967168 }
  0x13   :  { %415 = dma.done.wait [#allocation6], 640  }
  0x14   :  { %416 = vsyncadd [#allocation6], 4294966656 }
  0x15   :  { %417 = dma.done.wait [#allocation9], 768  }
  0x16   :  { %418 = vsyncadd [#allocation9], 4294966528  ;;  %v133_v0 = vld [vmem:[#allocation7 + $0x18] sm:$0xff]  ;;  %v102_v1 = vld [vmem:[#allocation8 + $0x8] sm:$0xff]  ;;  %vm106_vm0 = vcmask 130048   ;;  %vm134_vm1 = vcmask 261120  }
  0x17   :  { %v132_v2 = vld [vmem:[#allocation7 + $0x10] sm:$0xff]  ;;  %150 = vmatpush.msra.mxu1 %v133_v0  ;;  %124 = vmatpush.msra.mxu0 %v102_v1  ;;  %v101_v3 = vld [vmem:[#allocation8] sm:$0xff]  ;;  %v99_v4 = vld [vmem:[#allocation5] sm:$0xff]  ;;  %s429_s21 = smov 32   ;;  %s430_s22 = smov 96  }
  0x18   :  { %v131_v5 = vld [vmem:[#allocation7 + $0x8] sm:$0xff]  ;;  %v130_v6 = vld [vmem:[#allocation7] sm:$0xff]  ;;  %v98_v7 = vld [vmem:[#allocation2] sm:$0xff]  ;;  %s431_s23 = smov [#allocation11]   ;;  %s235_s27 = sshll.u32 %s497_s6, 4  ;;  %s236_s27 = int_to_ptr.hbm [resolvable:$true] %s235_s27 }
  0x19   :  { %151 = vmatpush.msra.mxu1 %v132_v2  ;;  %125 = vmatpush.msra.mxu0 %v101_v3  ;;  %v182_v8 = vld [vmem:[#allocation10 + $0x18] sm:$0xff]  ;;  %v181_v9 = vld [vmem:[#allocation10 + $0x10] sm:$0xff]  ;;  %v262_v10 = vld [vmem:[%s495_s4] ss:$0 sm:$0xff]  ;;  %s428_s4 = smov 64   ;;  %s233_s24 = sshll.u32 %s431_s23, 4  ;;  %s234_s24 = int_to_ptr.vmem [resolvable:$true] %s233_s24 }
  0x1a   :  { %247 = vmatmul.msk.f32.vlgmr.msra.gmra.mxu0 %vm106_vm0, %v99_v4  ;;  %198 = vmatpush.msra.mxu2 %v182_v8  ;;  %v180_v11 = vld [vmem:[#allocation10 + $0x8] sm:$0xff]  ;;  %v179_v12 = vld [vmem:[#allocation10] sm:$0xff] }
  0x1b   :  { %152 = vmatpush.msra.mxu1 %v131_v5 }
  0x1c   :  { %199 = vmatpush.msra.mxu2 %v181_v9 }
  0x1d   :  { %153 = vmatpush.msra.mxu1 %v130_v6 }
  0x1e   :  { %248 = vmatmul.msk.f32.vlgmr.msra.gmra.mxu1 %vm134_vm1, %v98_v7  ;;  %200 = vmatpush.msra.mxu2 %v180_v11 }
  0x20   :  { %201 = vmatpush.msra.mxu2 %v179_v12 }
  0x97   :  { %v127_v13 = vpop.f32.mrf.mxu0 }
  0x98   :  { %v128_v14 = vadd.f32 %v262_v10, %v127_v13 }
  0x9b   :  { %v155_v15 = vpop.f32.mrf.mxu1 }
  0x9c   :  { %v158_v16 = vadd.f32 %v155_v15, %v128_v14 }
  0x9e   :  { %v249_v17 = vmul.f32 -1.442695, %v158_v16 }
  0xa0   :  { %263 = vpow2.f32 %v249_v17 }
  0xa6   :  { %v264_v18 = vpop.eup %263 }
  0xa7   :  { %v162_v19 = vadd.f32 1.0, %v264_v18 }
  0xa9   :  { %265 = vrcp.f32 %v162_v19  ;;  %v174_v23 = vand.u32 2147483648, %v162_v19  ;;  %v172_v25 = vand.u32 2147483647, %v162_v19  ;;  %vm168_vm3 = vweird.f32 %v162_v19 }
  0xab   :  { %v175_v27 = vor.u32 1.1754944e-38, %v174_v23  ;;  %vm173_vm5 = vcmp.eq.f32.partialorder %v172_v25, 8.507059e+37 }
  0xaf   :  { %v266_v20 = vpop.eup %265 }
  0xb0   :  { %v164_v21 = vmul.f32 %v266_v20, %v162_v19  ;;  %vm169_vm2 = vweird.f32 %v266_v20 }
  0xb1   :  { %vm170_vm4 = vmor %vm168_vm3, %vm169_vm2 }
  0xb2   :  { %v165_v22 = vsub.f32 1.0, %v164_v21 }
  0xb4   :  { %v166_v24 = vmul.f32 %v266_v20, %v165_v22 }
  0xb6   :  { %v167_v26 = vadd.f32 %v266_v20, %v166_v24 }
  0xb8   :  { %v171_v28 = vsel %vm170_vm4, %v266_v20, %v167_v26 }
  0xb9   :  { %v176_v29 = vsel %vm173_vm5, %v175_v27, %v171_v28 }
  0xba   :  { %v178_v30 = vmul.f32 %v176_v29, %v98_v7  ;;  %v212_v36 = vsub.f32 1.0, %v176_v29 }
  0xbc   :  { %250 = vmatmul.msk.f32.vlgmr.msra.gmra.mxu2 %vm134_vm1, %v178_v30 }
 0x13f   :  { %v203_v31 = vpop.f32.mrf.mxu2 }
 0x140   :  { %207 = vrot.lane.b32.xlu0 %v203_v31, %s428_s4 }
 0x148   :  { %213 = vrot.lane.b32.xlu0 %v98_v7, %s429_s21 }
 0x1b2   :  { %v208_v32 = vpop.permute.xlu0 %207 }
 0x1b3   :  { %v210_v33 = vadd.f32 %v208_v32, %v128_v14 }
 0x1b5   :  { %267 = vtanh.f32 %v210_v33 }
 0x1ba   :  { %v214_v35 = vpop.permute.xlu0 %213 }
 0x1bb   :  { %v268_v34 = vpop.eup %267  ;;  %v216_v38 = vmul.f32 %v214_v35, %v212_v36 }
 0x1bc   :  { %218 = vrot.lane.b32.xlu1 %v268_v34, %s430_s22 }
 0x22e   :  { %v219_v37 = vpop.permute.xlu1 %218 }
 0x22f   :  { %v221_v39 = vmul.f32 %v219_v37, %v176_v29 }
 0x231   :  { %v222_v40 = vadd.f32 %v221_v39, %v216_v38 }
 0x233   :  { %224 = vrot.lane.b32.xlu1 %v222_v40, %s430_s22 }
 0x2a5   :  { %v225_v41 = vpop.permute.xlu1 %224 }
 0x2a6   :  { %227 = vst.msk [vmem:[#allocation11] sm:$0xff] %vm134_vm1, %v225_v41 }
 0x2a7   :  { %238 = dma.vmem_to_hbm [thread:$0]  %s234_s24, 128, %s236_s27, [#allocation4]  }
 0x2a8   :  { %419 = dma.done.wait [#allocation4], 128  }
 0x2a9   :  { %420 = vsyncadd [#allocation4], 4294967168 }
 0x2aa   :  { %243 = vsyncpa [#allocation3], 1 }
 0x2ab   :  { %244 = vsyncpa [#allocation6], 1 }
 0x2ac   :  { %245 = vsyncpa [#allocation9], 1 }
 0x2ad   :  { %246 = vsyncpa [#allocation4], 1 }

</bundles_post_ra>
